<compile_context>
chip_gen: v7x
topology: tpu7x:2x2x1
jax: 0.10.0
libtpu: 0.0.40
codegen_flags: <defaults>
</compile_context>

<pallas_src>
import functools

import jax
import jax.numpy as jnp
from jax.experimental import pallas as pl
from jax.experimental.pallas import tpu as pltpu

_LANE = 128
_SUBLANE = 8


def _round_up(x, m):
    return ((x + m - 1) // m) * m


def _vmem_limit_bytes():
    """~75% of this chip's physical VMEM (v7x: 64 MiB, v5e/v6e: 128 MiB)."""
    try:
        cap = int(pltpu.get_tpu_info().vmem_capacity_bytes)
    except Exception:
        cap = 64 * 1024 * 1024                      # v7x-safe fallback
    return int(min(96 * 1024 * 1024, max(32 * 1024 * 1024, cap * 3 // 4)))


# ---------------------------------------------------------------------------
# Kernels: each grid step reduces its tile to one f32 partial sum, stored at
# lane 0 of a lane-dense (1, 128) output block (~4 B of real output traffic).
# ---------------------------------------------------------------------------

def _write_partial(out_ref, partial):
    lane = jax.lax.broadcasted_iota(jnp.int32, (1, _LANE), 1)
    out_ref[...] = jnp.where(lane == 0, partial, 0.0).astype(jnp.float32)


def _ce_lane_dense_kernel(x_ref, t_ref, out_ref, *, one_minus_s, s_over_c,
                          n_valid, tile_cols):
    """Small-C path: x is (C, TN) — classes on sublanes, rows on lanes."""
    x = x_ref[...].astype(jnp.float32)                       # (C, TN)
    t = t_ref[...]                                           # (1, TN) int32

    m = jnp.max(x, axis=0, keepdims=True)                    # (1, TN)
    lse = jnp.log(jnp.sum(jnp.exp(x - m), axis=0, keepdims=True)) + m
    sum_x = jnp.sum(x, axis=0, keepdims=True)

    cls = jax.lax.broadcasted_iota(jnp.int32, x.shape, 0)
    x_t = jnp.sum(jnp.where(cls == t, x, 0.0), axis=0, keepdims=True)

    row_loss = lse - one_minus_s * x_t - s_over_c * sum_x    # (1, TN)

    # Mask the ragged tail (lanes past N hold undefined data); jnp.where is a
    # select, so NaN/Inf in the padding cannot leak into the partial sum.
    col = (pl.program_id(0) * tile_cols
           + jax.lax.broadcasted_iota(jnp.int32, (1, tile_cols), 1))
    row_loss = jnp.where(col < n_valid, row_loss, 0.0)

    _write_partial(out_ref, jnp.sum(row_loss, axis=1, keepdims=True))


def _ce_row_major_kernel(x_ref, t_ref, out_ref, *, one_minus_s, s_over_c,
                         n_valid, tile_rows):
    """Large-C path: x is (TM, C) — classes on lanes."""
    x = x_ref[...].astype(jnp.float32)                       # (TM, C)
    t = t_ref[...]                                           # (TM, 1) int32

    m = jnp.max(x, axis=-1, keepdims=True)                   # (TM, 1)
    lse = jnp.log(jnp.sum(jnp.exp(x - m), axis=-1, keepdims=True)) + m
    sum_x = jnp.sum(x, axis=-1, keepdims=True)

    cls = jax.lax.broadcasted_iota(jnp.int32, x.shape, 1)
    x_t = jnp.sum(jnp.where(cls == t, x, 0.0), axis=-1, keepdims=True)

    row_loss = lse - one_minus_s * x_t - s_over_c * sum_x    # (TM, 1)

    row = (pl.program_id(0) * tile_rows
           + jax.lax.broadcasted_iota(jnp.int32, (tile_rows, 1), 0))
    row_loss = jnp.where(row < n_valid, row_loss, 0.0)

    _write_partial(out_ref, jnp.sum(row_loss, axis=0, keepdims=True))


# ---------------------------------------------------------------------------
# Wrapper
# ---------------------------------------------------------------------------

def smoothed_cross_entropy_loss(logits, target, smoothing=0.1, *,
                                tile_cols=None, tile_rows=None):
    """logits: (B, S, C) float, target: (B, S) int -> scalar f32 = sum / B."""
    B = logits.shape[0]
    C = logits.shape[-1]
    N = 1
    for d in logits.shape[:-1]:
        N *= d
    itemsize = jnp.dtype(logits.dtype).itemsize

    vmem_limit = _vmem_limit_bytes()
    tile_budget = vmem_limit // 2          # double-buffered inputs + f32 temps
    compiler_params = pltpu.CompilerParams(
        dimension_semantics=("parallel",), vmem_limit_bytes=vmem_limit)

    one_minus_s = float(1.0 - smoothing)
    s_over_c = float(smoothing) / float(C)

    if C < _LANE:
        # ---- lane-dense path: rows -> lanes, classes -> sublanes -----------
        per_col = (2 * _round_up(C, 16) * itemsize    # logits block, dbl-buffered (bf16 packs 16 sublanes)
                   + 2 * _SUBLANE * 4                 # (1, tn) i32 targets, dbl-buffered, sublane-padded
                   + 2 * _round_up(C, _SUBLANE) * 4   # in-kernel f32 copy + exp temp
                   + 4 * _SUBLANE * 4)                # misc (1, tn) temporaries
        tn = max(_LANE, (tile_budget // per_col) // _LANE * _LANE)
        if tile_cols is not None:
            tn = min(tn, max(_LANE, _round_up(int(tile_cols), _LANE)))
        tn = min(tn, max(_LANE, _round_up(pl.cdiv(N, 2), _LANE)))   # keep >=2 grid steps
        grid = pl.cdiv(N, tn)

        # TODO(synk): move this relayout into the kernel (natural (tn, C)
        # blocks + in-kernel transpose) once Mosaic minor-dim-C transposes are
        # dependable; currently the one extra XLA pass over the logits.
        x = logits.reshape(N, C).T                    # (C, N)
        t = target.reshape(1, N).astype(jnp.int32)

        kern = functools.partial(
            _ce_lane_dense_kernel, one_minus_s=one_minus_s, s_over_c=s_over_c,
            n_valid=N, tile_cols=tn)
        partials = pl.pallas_call(
            kern,
            out_shape=jax.ShapeDtypeStruct((1, grid * _LANE), jnp.float32),
            grid_spec=pltpu.PrefetchScalarGridSpec(
                num_scalar_prefetch=0,
                grid=(grid,),
                in_specs=[
                    pl.BlockSpec((C, tn), lambda i: (0, i)),
                    pl.BlockSpec((1, tn), lambda i: (0, i)),
                ],
                out_specs=pl.BlockSpec((1, _LANE), lambda i: (0, i)),
            ),
            compiler_params=compiler_params,
        )(x, t)
    else:
        # ---- row-major path: classes -> lanes -------------------------------
        # TODO(synk): vocab-scale C exceeding the single-block VMEM budget
        # would need an extra grid axis tiling C with a carried lse.
        c_lanes = _round_up(C, _LANE)
        per_row = (2 * c_lanes * itemsize             # logits block, dbl-buffered
                   + 2 * _LANE * 4                    # (tm, 1) i32 targets, lane-padded, dbl-buffered
                   + 2 * c_lanes * 4                  # in-kernel f32 copy + exp temp
                   + 4 * _LANE * 4)                   # (tm, 1) f32 temporaries, lane-padded
        tm = max(_SUBLANE, (tile_budget // per_row) // _SUBLANE * _SUBLANE)
        if tile_rows is not None:
            tm = min(tm, max(_SUBLANE, _round_up(int(tile_rows), _SUBLANE)))
        tm = min(tm, max(_SUBLANE, _round_up(pl.cdiv(N, 2), _SUBLANE)))  # keep >=2 grid steps
        grid = pl.cdiv(N, tm)

        x = logits.reshape(N, C)
        t = target.reshape(N, 1).astype(jnp.int32)

        kern = functools.partial(
            _ce_row_major_kernel, one_minus_s=one_minus_s, s_over_c=s_over_c,
            n_valid=N, tile_rows=tm)
        partials = pl.pallas_call(
            kern,
            out_shape=jax.ShapeDtypeStruct((1, grid * _LANE), jnp.float32),
            grid_spec=pltpu.PrefetchScalarGridSpec(
                num_scalar_prefetch=0,
                grid=(grid,),
                in_specs=[
                    pl.BlockSpec((tm, C), lambda i: (i, 0)),
                    pl.BlockSpec((tm, 1), lambda i: (i, 0)),
                ],
                out_specs=pl.BlockSpec((1, _LANE), lambda i: (0, i)),
            ),
            compiler_params=compiler_params,
        )(x, t)

    # Tiny (1, grid*128) slab: only lane 0 of each block is non-zero.
    return jnp.sum(partials) / jnp.float32(B)


if __name__ == "__main__":
    key = jax.random.PRNGKey(0)
    ks = jax.random.split(key, 8)
    smoothing = 0.1

    def _reference(lg, tg, s):
        B = lg.shape[0]
        C = lg.shape[-1]
        logp = jax.nn.log_softmax(lg, axis=-1)
        smt = (1.0 - s) * jax.nn.one_hot(tg, C, dtype=logp.dtype) + s / C
        return -jnp.sum(logp * smt) / B

    def _check(lg, tg):
        out = jax.block_until_ready(smoothed_cross_entropy_loss(lg, tg, smoothing))
        ref = _reference(lg, tg, smoothing)
        assert jnp.allclose(out, ref, rtol=1e-4, atol=1e-5), (out, ref)

    # Module's shapes: (batch=4, seq_l=128, num_classes=3) -> lane-dense path.
    logits = jax.random.normal(ks[0], (4, 128, 3), dtype=jnp.float32)
    target = jax.random.randint(ks[1], (4, 128), 0, 3, dtype=jnp.int32)
    _check(logits, target)

    # Ragged row count (exercises in-kernel tail masking), still C=3.
    logits = jax.random.normal(ks[2], (3, 50, 3), dtype=jnp.float32)
    target = jax.random.randint(ks[3], (3, 50), 0, 3, dtype=jnp.int32)
    _check(logits, target)

    # Larger class count -> row-major path.
    logits = jax.random.normal(ks[4], (2, 64, 256), dtype=jnp.float32)
    target = jax.random.randint(ks[5], (2, 64), 0, 256, dtype=jnp.int32)
    _check(logits, target)

    # Row-major path with a ragged row tile.
    logits = jax.random.normal(ks[6], (2, 50, 256), dtype=jnp.float32)
    target = jax.random.randint(ks[7], (2, 50), 0, 256, dtype=jnp.int32)
    _check(logits, target)

    print("KERNEL_OK")
</pallas_src>

<mosaic_0001>
module attributes {stable_mosaic.version = 11 : i64} {
  func.func @_ce_lane_dense_kernel(%arg0: i32, %arg1: memref<3x256xf32, #tpu.memory_space<vmem>>, %arg2: memref<1x256xi32, #tpu.memory_space<vmem>>, %arg3: memref<1x128xf32, #tpu.memory_space<vmem>>) attributes {dimension_semantics = [#tpu.dimension_semantics<parallel>], iteration_bounds = array<i64: 2>, scalar_prefetch = 0 : i64, scratch_operands = 0 : i64, tpu.core_type = #tpu.core_type<tc>, window_params = [{transform_indices = @transform_0, window_bounds = array<i64: 3, 256>}, {transform_indices = @transform_1, window_bounds = array<i64: 1, 256>}, {transform_indices = @transform_2, window_bounds = array<i64: 1, 128>}]} {
    %c0 = arith.constant 0 : index
    %c0_0 = arith.constant 0 : index
    %0 = vector.load %arg1[%c0, %c0_0] : memref<3x256xf32, #tpu.memory_space<vmem>>, vector<3x256xf32>
    %c0_1 = arith.constant 0 : index
    %c0_2 = arith.constant 0 : index
    %1 = vector.load %arg2[%c0_1, %c0_2] : memref<1x256xi32, #tpu.memory_space<vmem>>, vector<1x256xi32>
    %cst = arith.constant dense<0xFF800000> : vector<256xf32>
    %2 = vector.multi_reduction <maximumf>, %0, %cst [0] : vector<3x256xf32> to vector<256xf32>
    %3 = vector.shape_cast %2 : vector<256xf32> to vector<1x256xf32>
    %4 = vector.broadcast %3 : vector<1x256xf32> to vector<3x256xf32>
    %5 = arith.subf %0, %4 : vector<3x256xf32>
    %6 = math.exp %5 : vector<3x256xf32>
    %cst_3 = arith.constant dense<0.000000e+00> : vector<256xf32>
    %7 = vector.multi_reduction <add>, %6, %cst_3 [0] : vector<3x256xf32> to vector<256xf32>
    %8 = vector.shape_cast %7 : vector<256xf32> to vector<1x256xf32>
    %9 = math.log %8 : vector<1x256xf32>
    %10 = arith.addf %9, %3 : vector<1x256xf32>
    %cst_4 = arith.constant dense<0.000000e+00> : vector<256xf32>
    %11 = vector.multi_reduction <add>, %0, %cst_4 [0] : vector<3x256xf32> to vector<256xf32>
    %12 = vector.shape_cast %11 : vector<256xf32> to vector<1x256xf32>
    %13 = tpu.iota {dimensions = array<i32: 0>} : vector<3x256xi32>
    %14 = vector.broadcast %1 : vector<1x256xi32> to vector<3x256xi32>
    %15 = arith.cmpi eq, %13, %14 : vector<3x256xi32>
    %cst_5 = arith.constant 0.000000e+00 : f32
    %16 = vector.broadcast %cst_5 : f32 to vector<3x256xf32>
    %17 = arith.select %15, %0, %16 : vector<3x256xi1>, vector<3x256xf32>
    %cst_6 = arith.constant dense<0.000000e+00> : vector<256xf32>
    %18 = vector.multi_reduction <add>, %17, %cst_6 [0] : vector<3x256xf32> to vector<256xf32>
    %19 = vector.shape_cast %18 : vector<256xf32> to vector<1x256xf32>
    %cst_7 = arith.constant 0.899999976 : f32
    %20 = vector.broadcast %cst_7 : f32 to vector<1x256xf32>
    %21 = arith.mulf %20, %19 : vector<1x256xf32>
    %22 = arith.subf %10, %21 : vector<1x256xf32>
    %cst_8 = arith.constant 0.0333333351 : f32
    %23 = vector.broadcast %cst_8 : f32 to vector<1x256xf32>
    %24 = arith.mulf %23, %12 : vector<1x256xf32>
    %25 = arith.subf %22, %24 : vector<1x256xf32>
    %c256_i32 = arith.constant 256 : i32
    %26 = arith.muli %arg0, %c256_i32 : i32
    %27 = tpu.iota {dimensions = array<i32: 1>} : vector<1x256xi32>
    %28 = vector.broadcast %26 : i32 to vector<1x256xi32>
    %29 = arith.addi %28, %27 : vector<1x256xi32>
    %c512_i32 = arith.constant 512 : i32
    %30 = vector.broadcast %c512_i32 : i32 to vector<1x256xi32>
    %31 = arith.cmpi slt, %29, %30 : vector<1x256xi32>
    %cst_9 = arith.constant 0.000000e+00 : f32
    %32 = vector.broadcast %cst_9 : f32 to vector<1x256xf32>
    %33 = arith.select %31, %25, %32 : vector<1x256xi1>, vector<1x256xf32>
    %cst_10 = arith.constant dense<0.000000e+00> : vector<1xf32>
    %34 = vector.multi_reduction <add>, %33, %cst_10 [1] : vector<1x256xf32> to vector<1xf32>
    %35 = vector.shape_cast %34 : vector<1xf32> to vector<1x1xf32>
    %36 = tpu.iota {dimensions = array<i32: 1>} : vector<1x128xi32>
    %c0_i32 = arith.constant 0 : i32
    %37 = vector.broadcast %c0_i32 : i32 to vector<1x128xi32>
    %38 = arith.cmpi eq, %36, %37 : vector<1x128xi32>
    %cst_11 = arith.constant 0.000000e+00 : f32
    %39 = vector.shape_cast %35 : vector<1x1xf32> to vector<1x1xf32>
    %40 = vector.broadcast %39 : vector<1x1xf32> to vector<1x128xf32>
    %41 = vector.broadcast %cst_11 : f32 to vector<1x128xf32>
    %42 = arith.select %38, %40, %41 : vector<1x128xi1>, vector<1x128xf32>
    %c0_12 = arith.constant 0 : index
    %c0_13 = arith.constant 0 : index
    %43 = vector.load %arg3[%c0_12, %c0_13] : memref<1x128xf32, #tpu.memory_space<vmem>>, vector<1x128xf32>
    tpu.vector_store %arg3[%c0_12, %c0_13], %42 {strides = array<i32>} : memref<1x128xf32, #tpu.memory_space<vmem>>, vector<1x128xf32>,
    return
  }
  func.func @transform_0(%arg0: i32) -> (i32, i32) {
    %c0_i32 = arith.constant 0 : i32
    %c0_i32_0 = arith.constant 0 : i32
    return %c0_i32, %arg0 : i32, i32
  }
  func.func @transform_1(%arg0: i32) -> (i32, i32) {
    %c0_i32 = arith.constant 0 : i32
    %c0_i32_0 = arith.constant 0 : i32
    return %c0_i32, %arg0 : i32, i32
  }
  func.func @transform_2(%arg0: i32) -> (i32, i32) {
    %c0_i32 = arith.constant 0 : i32
    %c0_i32_0 = arith.constant 0 : i32
    return %c0_i32, %arg0 : i32, i32
  }
}

</mosaic_0001>

<bundles_post_ra>
// kernel: tpu_custom_call.1
= control target key start
LH: loop header
LB: loop body
LE: loop exit
PB: predicated region body
PF: predicated region fallthrough
CT: control target
= control target key end

     0   :  { %7 = vsyncpa [#allocation3], 0  ;;  %s866_s0 = inlined_call_operand.hbm [shape: f32[3,512], index: 0, kind: input, shape index: {}]   ;;  %s867_s1 = inlined_call_operand.hbm [shape: s32[1,512], index: 1, kind: input, shape index: {}]   ;;  %s868_s2 = inlined_call_operand.hbm [shape: f32[1,256], index: 2, kind: output, shape index: {}]  }
   0x1   :  { %9 = vsyncpa [#allocation3 + $0x1], 0 }
   0x2   :  { %10 = vsyncpa [#allocation6], 0 }
   0x3   :  { %12 = vsyncpa [#allocation6 + $0x1], 0 }
   0x4   :  { %13 = vsyncpa [#allocation4], 0 }
   0x5   :  { %15 = vsyncpa [#allocation4 + $0x1], 0  ;;  %s644_s9 = smov 0   ;;  %s646_s10 = smov 0  }
   0x6   :  { %s648_s11 = smov 0   ;;  %s650_s12 = smov 0  }
   0x7 LB: > { %s665_s13 = sadd.s32 4294967295, %s624_s12   ;;  %s418_s14 = sadd.s32 4294967294, %s624_s12   ;;  %s624_s12 = sphi %s650_s12, %s887_s12   ;;  %s620_s11 = sphi %s648_s11, %s886_s11   ;;  %s616_s10 = sphi %s646_s10, %s885_s10   ;;  %s612_s9 = sphi %s644_s9, %s884_s9  }
   0x8   : > { %s669_s15 = sadd.s32 1, %s624_s12   ;;  %s28_s16 = sadd.s32 1, %s620_s11 }
   0x9   : > { %s25_s17 = ssub.s32 %s624_s12, %s669_s15  ;;  %p35_p0 = scmp.ne.s32.totalorder %s620_s11, %s616_s10 }
   0xa   : > { %p26_p1 = scmp.eq.s32.totalorder %s25_s17, 0  ;;  %p36_p2 = scmp.eq.s32.totalorder %s624_s12, 0 }
   0xb   : > { %p41_p3 = scmp.ne.s32.totalorder %s616_s10, %s612_s9  ;;  %p42_p4 = scmp.eq.s32.totalorder %s665_s13, 0 }
   0xc   : > { %s681_s18 = scalar_select %p26_p1, %s620_s11, %s28_s16  }
   0xd   : > { %p683_p5 = por %p36_p2, %p35_p0  ;;  %p687_p6 = por %p42_p4, %p41_p3 }
   0xe   : > { %p91_p7 = scmp.eq.s32.totalorder %s665_s13, 1  ;;  %p97_p8 = scmp.eq.s32.totalorder %s418_s14, 1 }
   0xf   : > { %s872_s20 = scalar_select %p687_p6, 1, 0 }
  0x10   : > { %p453_p10 = scmp.lt.s32.totalorder %s624_s12, 2  ;;  %p694_p11 = por %p91_p7, %p35_p0 }
  0x11   : > { %p698_p12 = por %p97_p8, %p41_p3  ;;  %s703_s23 = sand.u32 1, %s620_s11  }
  0x12   : > { %s873_s21 = scalar_select %p694_p11, 1, 0 }
  0x13   : > { %s874_s22 = scalar_select %p698_p12, 1, 0 }
  0x14   : > { %s434_s24 = sshll.u32 %s624_s12, 7  ;;  %s421_s25 = sshll.u32 %s703_s23, 3 }
  0x15   : > { %s710_s28 = scalar_lea.hbm %s866_s0, %s434_s24  ;;  %s121_s29 = scalar_lea.vmem [#allocation2], %s421_s25 }
  0x16   : > { %s129_s30 = sshll.u32 %s121_s29, 4  ;;  %p714_p13 = pnand %p453_p10, %p683_p5  ;;  %s718_s30 = int_to_ptr.vmem [resolvable:$true] %s129_s30 }
  0x17   : > { %s118_s4 = scalar_lea.sflag [#allocation3], %s703_s23  ;;  %s494_s5 = scalar_lea.hbm %s710_s28, 128 }
  0x18   : > { %p495_p2 = scmp.ne.s32.totalorder %s710_s28, %s494_s5  ;;  %p496_p3 = pneg %p714_p13 }
  0x19   : > { %s499_s8 = scalar_lea.hbm %s866_s0, 256  ;;  %p500_p5 = scmp.lt.u32.totalorder %s710_s28, %s866_s0 }
  0x1a   : > { %p497_p4 = pnand %p496_p3, %p495_p2  ;;  %p501_p8 = scmp.lt.u32.totalorder %s499_s8, %s494_s5 }
  0x1b   : > { %p503_p9 = scmp.lt.u32.totalorder %s494_s5, %s710_s28 }
  0x1c   : > { %p498_p7 = pneg %p497_p4  ;;  %p502_p10 = por %p501_p8, %p500_p5 }
  0x1e   : > { %p504_p0 = por %p503_p9, %p502_p10 }
  0x20   : > { %p505_p1 = pnand %p504_p0, %p498_p7 }
  0x22   : > { %508 = shalt.err (!%p505_p1)
}
  0x23   : > { %s509_s17 = scalar_lea.vmem %s718_s30, 128  ;;  %s626_s19 = smov [#allocation2]  }
  0x24   : > { %p510_p2 = scmp.ne.s32.totalorder %s718_s30, %s509_s17  ;;  %s514_s24 = sshll.u32 %s626_s19, 4  ;;  %s515_s24 = int_to_ptr.vmem [resolvable:$false] %s514_s24 }
  0x25   : > { %s516_s25 = scalar_lea.vmem %s515_s24, 256  ;;  %p517_p11 = scmp.lt.s32.totalorder %s718_s30, %s515_s24 }
  0x26   : > { %p512_p4 = pnand %p510_p2, %p496_p3  ;;  %p518_p5 = scmp.lt.s32.totalorder %s516_s25, %s509_s17 }
  0x28   : > { %p513_p12 = pneg %p512_p4  ;;  %p519_p8 = por %p518_p5, %p517_p11 }
  0x2a   : > { %p520_p9 = pnand %p519_p8, %p513_p12 }
  0x2c   : > { %523 = shalt.err (!%p520_p9)
}
  0x2d   : > { %445 = dma.hbm_to_vmem [thread:$0]  (!%p714_p13), %s710_s28, 128, %s718_s30, %s118_s4  }
  0x2e   : > { %p876_p0 = scmp.lt.s32.totalorder %s624_s12, 3  ;;  %p877_p1 = scmp.ge.s32.totalorder %s624_s12, 1 }
  0x2f   : > { %s424_s27 = sshll.u32 %s703_s23, 1  ;;  %s435_s29 = sshll.u32 %s624_s12, 5 }
  0x30   : > { %p752_p7 = pnand %p877_p1, %p876_p0  ;;  %s761_s7 = scalar_lea.hbm %s867_s1, %s435_s29 }
  0x31   : > { %s140_s8 = scalar_lea.vmem [#allocation5], %s424_s27  ;;  %s137_s28 = scalar_lea.sflag [#allocation6], %s703_s23 }
  0x32   : > { %s878_s26 = scalar_select %p752_p7, 1, 0 }
  0x33   : > { %s148_s14 = sshll.u32 %s140_s8, 4  ;;  %s524_s30 = scalar_lea.hbm %s761_s7, 32  ;;  %s149_s14 = int_to_ptr.vmem [resolvable:$true] %s148_s14 }
  0x34   : > { %p525_p11 = scmp.ne.s32.totalorder %s761_s7, %s524_s30  ;;  %s529_s17 = scalar_lea.hbm %s867_s1, 64 }
  0x35   : > { %p530_p2 = scmp.lt.u32.totalorder %s761_s7, %s867_s1  ;;  %p531_p4 = scmp.lt.u32.totalorder %s529_s17, %s524_s30 }
  0x36   : > { %p527_p12 = pnand %p525_p11, %p496_p3  ;;  %p533_p8 = scmp.lt.u32.totalorder %s524_s30, %s761_s7 }
  0x37   : > { %p532_p5 = por %p531_p4, %p530_p2 }
  0x38   : > { %p528_p10 = pneg %p527_p12 }
  0x39   : > { %p534_p9 = por %p533_p8, %p532_p5 }
  0x3b   : > { %p535_p0 = pnand %p534_p9, %p528_p10 }
  0x3d   : > { %538 = shalt.err (!%p535_p0)
}
  0x3e   : > { %s539_s23 = scalar_lea.vmem %s149_s14, 32  ;;  %s627_s25 = smov [#allocation5]  }
  0x3f   : > { %p540_p1 = scmp.ne.s32.totalorder %s149_s14, %s539_s23  ;;  %s544_s27 = sshll.u32 %s627_s25, 4  ;;  %s545_s27 = int_to_ptr.vmem [resolvable:$false] %s544_s27 }
  0x40   : > { %s546_s29 = scalar_lea.vmem %s545_s27, 64  ;;  %p547_p6 = scmp.lt.s32.totalorder %s149_s14, %s545_s27 }
  0x41   : > { %p542_p11 = pnand %p540_p1, %p496_p3  ;;  %p548_p7 = scmp.lt.s32.totalorder %s546_s29, %s539_s23 }
  0x43   : > { %p543_p12 = pneg %p542_p11  ;;  %p549_p2 = por %p548_p7, %p547_p6 }
  0x45   : > { %p550_p4 = pnand %p549_p2, %p543_p12 }
  0x47   : > { %553 = shalt.err (!%p550_p4)
}
  0x48   : > { %448 = dma.hbm_to_vmem [thread:$0]  (!%p714_p13), %s761_s7, 32, %s149_s14, %s137_s28  }
  0x49   : > { %p879_p10 = scmp.ne.s32.totalorder %s878_s26, 0 }
  0x4a   : > { %s786_s5 = sand.u32 (!%p879_p10), 1, %s616_s10   ;;  %p880_p3 = scmp.ne.s32.totalorder (!%p879_p10), %s872_s20, 0 }
  0x4b   : > { %157 = sbr.rel (%p879_p10) target bundleno = 313 (0x139), region = 28  ;;  %s428_s6 = sshll.u32 (!%p879_p10), %s786_s5, 3 }
  0x4c   : > { %s160_s8 = scalar_lea.sflag (!%p879_p10), [#allocation3], %s786_s5  ;;  %s163_s30 = scalar_lea.vmem (!%p879_p10), [#allocation2], %s428_s6 }
  0x52   : > { %599 = dma.done.wait (%p880_p3), %s160_s8, 128  }
  0x53   : > { %601 = vsyncadd (%p880_p3), %s160_s8, 4294967168  ;;  %s429_s3 = sshll.u32 %s786_s5, 1  ;;  %s169_s26 = scalar_lea.sflag [#allocation6], %s786_s5 }
  0x54   : > { %s172_s7 = scalar_lea.vmem [#allocation5], %s429_s3 }
  0x55   : > { %603 = dma.done.wait (%p880_p3), %s169_s26, 32  }
  0x56   : > { %605 = vsyncadd (%p880_p3), %s169_s26, 4294967264  ;;  %vm204_vm0 = vcmask 1042432   ;;  %v199_v0 = vld [vmem:[%s163_s30] sm:$0x77]  ;;  %v263_v11 = vlaneseq  ;;  %v200_v20 = vld [vmem:[%s172_s7] sm:$0x3] }
  0x57   : > { %v202_v1 = vcombine.high %v199_v0, %v199_v0  ;;  %v205_v2 = vsel %vm204_vm0, %v199_v0, -inf  ;;  %v249_v30 = vsel %vm204_vm0, %v199_v0, 0.0  ;;  %s430_s20 = sshll.u32 %s665_s13, 8  ;;  %s431_s14 = sshll.u32 %s665_s13, 4 }
  0x58   : > { %v206_v3 = vrot.slane %v205_v2, 4  ;;  %v264_v16 = vshrl.u32 %v263_v11, 7  ;;  %v250_v38 = vrot.slane %v249_v30, 4  ;;  %s196_s28 = scalar_lea.vmem [#allocation7], %s786_s5  ;;  %s822_s19 = scalar_lea.hbm %s868_s2, %s431_s14 }
  0x59   : > { %v212_v4 = vsel %vm204_vm0, %v202_v1, -inf  ;;  %v256_v36 = vsel %vm204_vm0, %v202_v1, 0.0  ;;  %s329_s4 = sshll.u32 %s196_s28, 4  ;;  %s317_s24 = scalar_lea.sflag [#allocation4], %s786_s5  ;;  %s824_s4 = int_to_ptr.vmem [resolvable:$true] %s329_s4 }
  0x5a   : > { %v207_v5 = vmax.f32 %v205_v2, %v206_v3  ;;  %v213_v6 = vrot.slane %v212_v4, 4  ;;  %v267_v19 = vsub.s32 0, %v264_v16  ;;  %v271_v22 = vsub.s32 1, %v264_v16  ;;  %s554_s23 = scalar_lea.vmem %s824_s4, 16  ;;  %p881_p13 = scmp.ne.s32.totalorder %s873_s21, 0 }
  0x5b   : > { %v257_v42 = vrot.slane %v256_v36, 4  ;;  %v251_v46 = vadd.f32 %v250_v38, %v249_v30  ;;  %v301_v3 = vand.u32 127, %v263_v11  ;;  %p555_p6 = scmp.ne.s32.totalorder %s824_s4, %s554_s23  ;;  %s628_s13 = smov [#allocation7]  }
  0x5c   : > { %v208_v7 = vrot.slane %v207_v5, 2  ;;  %v214_v8 = vmax.f32 %v212_v4, %v213_v6  ;;  %v268_v24 = vrot.slane %v200_v20, %v267_v19  ;;  %v272_v25 = vrot.slane %v200_v20, %v271_v22  ;;  %s558_s25 = sshll.u32 %s628_s13, 4  ;;  %s559_s25 = int_to_ptr.vmem [resolvable:$false] %s558_s25 }
  0x5d   : > { %v258_v50 = vadd.f32 %v257_v42, %v256_v36  ;;  %v252_v54 = vrot.slane %v251_v46, 2  ;;  %vm313_vm5 = vcmp.eq.s32.totalorder %v301_v3, 0  ;;  %p556_p7 = pnand %p555_p6, %p881_p13  ;;  %s560_s27 = scalar_lea.vmem %s559_s25, 32 }
  0x5e   : > { %v209_v9 = vmax.f32 %v207_v5, %v208_v7  ;;  %v215_v10 = vrot.slane %v214_v8, 2  ;;  %vm273_vm1 = vcmp.eq.s32.totalorder %v264_v16, %v268_v24  ;;  %vm274_vm2 = vcmp.eq.s32.totalorder %v264_v16, %v272_v25  ;;  %p561_p8 = scmp.lt.s32.totalorder %s824_s4, %s559_s25  ;;  %p562_p9 = scmp.lt.s32.totalorder %s560_s27, %s554_s23 }
  0x5f   : > { %v275_v26 = vsel %vm273_vm1, %v199_v0, 0.0  ;;  %v276_v27 = vsel %vm274_vm2, %v202_v1, 0.0  ;;  %v259_v58 = vrot.slane %v258_v50, 2  ;;  %v253_v61 = vadd.f32 %v252_v54, %v251_v46  ;;  %p557_p5 = pneg %p556_p7 }
  0x60   : > { %v210_v12 = vrot.slane %v209_v9, 1  ;;  %v216_v13 = vmax.f32 %v214_v8, %v215_v10  ;;  %v277_v28 = vsel %vm204_vm0, %v275_v26, 0.0  ;;  %v284_v31 = vsel %vm204_vm0, %v276_v27, 0.0  ;;  %p563_p0 = por %p562_p9, %p561_p8 }
  0x61   : > { %v278_v34 = vrot.slane %v277_v28, 4  ;;  %v285_v39 = vrot.slane %v284_v31, 4  ;;  %v260_v63 = vadd.f32 %v259_v58, %v258_v50  ;;  %v254_v1 = vrot.slane %v253_v61, 1 }
  0x62   : > { %v802_v14 = vmax.f32 %v209_v9, %v210_v12  ;;  %v217_v15 = vrot.slane %v216_v13, 1  ;;  %v303_v8 = vstv %s430_s20  ;;  %v302_v10 = vadd.s32 128, %v301_v3  ;;  %p564_p1 = pnand %p563_p0, %p557_p5 }
  0x63   : > { %v279_v43 = vadd.f32 %v278_v34, %v277_v28  ;;  %v286_v47 = vadd.f32 %v285_v39, %v284_v31  ;;  %v261_v4 = vrot.slane %v260_v63, 1  ;;  %v255_v6 = vadd.f32 %v254_v1, %v253_v61 }
  0x64   : > { %v804_v17 = vmax.f32 %v216_v13, %v217_v15  ;;  %v305_v11 = vadd.s32 %v303_v8, %v302_v10 }
  0x65   : > { %v280_v51 = vrot.slane %v279_v43, 2  ;;  %v287_v55 = vrot.slane %v286_v47, 2  ;;  %v262_v13 = vadd.f32 %v261_v4, %v260_v63  ;;  %v295_v22 = vmul.f32 0.033333335, %v255_v6 }
  0x66   : > { %v221_v18 = vcombine.low %v802_v14, %v804_v17  ;;  %vm307_vm4 = vcmp.lt.s32.totalorder %v305_v11, 512 }
  0x67   : > { %v281_v59 = vadd.f32 %v280_v51, %v279_v43  ;;  %v288_v62 = vadd.f32 %v287_v55, %v286_v47  ;;  %v296_v25 = vmul.f32 0.033333335, %v262_v13 }
  0x68   : > { %v223_v21 = vsub.f32 %v199_v0, %v221_v18  ;;  %v304_v18 = vadd.s32 %v303_v8, %v301_v3 }
  0x69   : > { %v282_v0 = vrot.slane %v281_v59, 1  ;;  %v289_v2 = vrot.slane %v288_v62, 1 }
  0x6a   : > { %v224_v23 = vmul.f32 1.442695, %v223_v21  ;;  %vm306_vm3 = vcmp.lt.s32.totalorder %v304_v18, 512 }
  0x6b   : > { %v283_v5 = vadd.f32 %v282_v0, %v281_v59  ;;  %v290_v7 = vadd.f32 %v289_v2, %v288_v62 }
  0x6c   : > { %488 = vpow2.f32 %v224_v23 }
  0x6d   : > { %v291_v15 = vmul.f32 0.9, %v283_v5  ;;  %v292_v21 = vmul.f32 0.9, %v290_v7 }
  0x76   : > { %v489_v29 = vpop.eup %488 }
  0x77   : > { %v227_v32 = vcombine.high %v489_v29, %v489_v29  ;;  %v229_v33 = vsel %vm204_vm0, %v489_v29, 0.0 }
  0x78   : > { %v230_v35 = vrot.slane %v229_v33, 4 }
  0x79   : > { %v236_v37 = vsel %vm204_vm0, %v227_v32, 0.0 }
  0x7a   : > { %v231_v40 = vadd.f32 %v230_v35, %v229_v33  ;;  %v237_v41 = vrot.slane %v236_v37, 4 }
  0x7c   : > { %v232_v44 = vrot.slane %v231_v40, 2  ;;  %v238_v45 = vadd.f32 %v237_v41, %v236_v37 }
  0x7e   : > { %v233_v48 = vadd.f32 %v232_v44, %v231_v40  ;;  %v239_v49 = vrot.slane %v238_v45, 2 }
  0x80   : > { %v234_v52 = vrot.slane %v233_v48, 1  ;;  %v240_v53 = vadd.f32 %v239_v49, %v238_v45 }
  0x82   : > { %v235_v56 = vadd.f32 %v234_v52, %v233_v48  ;;  %v241_v57 = vrot.slane %v240_v53, 1 }
  0x84   : > { %v242_v60 = vadd.f32 %v241_v57, %v240_v53  ;;  %490 = vlog2.f32 %v235_v56 }
  0x86   : > { %492 = vlog2.f32 %v242_v60 }
  0x8e   : > { %v491_v9 = vpop.eup %490 }
  0x8f   : > { %v244_v12 = vmul.f32 0.6931472, %v491_v9 }
  0x90   : > { %v493_v16 = vpop.eup %492 }
  0x91   : > { %v246_v19 = vmul.f32 0.6931472, %v493_v16  ;;  %v247_v20 = vadd.f32 %v244_v12, %v802_v14 }
  0x93   : > { %v248_v23 = vadd.f32 %v246_v19, %v804_v17  ;;  %v293_v24 = vsub.f32 %v247_v20, %v291_v15 }
  0x95   : > { %v294_v26 = vsub.f32 %v248_v23, %v292_v21  ;;  %v297_v27 = vsub.f32 %v293_v24, %v295_v22 }
  0x97   : > { %v298_v28 = vsub.f32 %v294_v26, %v296_v25  ;;  %v308_v29 = vsel %vm306_vm3, %v297_v27, 0.0 }
  0x99   : > { %v309_v30 = vsel %vm307_vm4, %v298_v28, 0.0 }
  0x9a   : > { %v310_v31 = vadd.f32 %v309_v30, %v308_v29 }
  0x9c   : > { %311 = vadd.xlane.f32.xlu0 %v310_v31 }
 0x129   : > { %v312_v14 = vpop.xlane.xlu0 %311 }
 0x12a   : > { %v314_v17 = vsel %vm313_vm5, %v312_v14, 0.0 }
 0x12b   : > { %315 = vst [vmem:[%s196_s28] sm:$0x1] %v314_v17 }
 0x12c   : > { %567 = shalt.err (!%p564_p1)
}
 0x12d   : > { %s568_s29 = scalar_lea.hbm %s822_s19, 16  ;;  %s572_s8 = scalar_lea.hbm %s868_s2, 32 }
 0x12e   : > { %p569_p11 = scmp.ne.s32.totalorder %s822_s19, %s568_s29  ;;  %p573_p4 = scmp.lt.u32.totalorder %s822_s19, %s868_s2 }
 0x12f   : > { %p574_p10 = scmp.lt.u32.totalorder %s572_s8, %s568_s29  ;;  %p576_p6 = scmp.lt.u32.totalorder %s568_s29, %s822_s19 }
 0x130   : > { %p570_p12 = pnand %p569_p11, %p881_p13 }
 0x131   : > { %p575_p3 = por %p574_p10, %p573_p4 }
 0x132   : > { %p571_p2 = pneg %p570_p12 }
 0x133   : > { %p577_p7 = por %p576_p6, %p575_p3 }
 0x135   : > { %p578_p5 = pnand %p577_p7, %p571_p2 }
 0x137   : > { %581 = shalt.err (!%p578_p5)
}
 0x138   : > { %440 = dma.vmem_to_hbm [thread:$0]  (%p881_p13), %s824_s4, 16, %s822_s19, %s317_s24  }
 0x139 PF: > { %s341_s26 = sand.u32 1, %s612_s9   ;;  %p882_p8 = scmp.ne.s32.totalorder %s874_s22, 0 }
 0x13a   : > { %p883_p9 = scmp.ge.s32.totalorder %s624_s12, 2  ;;  %s342_s7 = scalar_lea.sflag [#allocation4], %s341_s26 }
 0x13c   : > { %p450_p0 = pnand %p883_p9, %p882_p8 }
 0x13e   : > { %607 = dma.done.wait (!%p450_p0), %s342_s7, 16  }
 0x13f   : > { %609 = vsyncadd (!%p450_p0), %s342_s7, 4294967280  ;;  %p18_p1 = scmp.ge.s32.totalorder %s669_s15, 4   ;;  %s884_s9 = smov %s616_s10 }
 0x140   : > { %s885_s10 = smov %s620_s11  ;;  %s886_s11 = smov %s681_s18 }
 0x141   : > { %s887_s12 = smov %s669_s15  ;;  %20 = sbr.rel (!%p18_p1) target bundleno = 7 (0x7), region = 86 }
 0x148   :  { %346 = vsyncpa [#allocation3], 1 }
 0x149   :  { %348 = vsyncpa [#allocation3 + $0x1], 1 }
 0x14a   :  { %349 = vsyncpa [#allocation6], 1 }
 0x14b   :  { %351 = vsyncpa [#allocation6 + $0x1], 1 }
 0x14c   :  { %352 = vsyncpa [#allocation4], 1 }
 0x14d   :  { %354 = vsyncpa [#allocation4 + $0x1], 1 }

</bundles_post_ra>
